<compile_context>
chip_gen: v7x
topology: tpu7x:2x2x1
jax: 0.10.0
libtpu: 0.0.40
codegen_flags: <defaults>
</compile_context>

<pallas_src>
import functools

import jax
import jax.numpy as jnp
from jax.experimental import pallas as pl
from jax.experimental.pallas import tpu as pltpu


def _aspp_kernel(x_ref, w_ref, b_ref, gamma_ref, beta_ref, o_ref,
                 *, C_out, S, group_size, eps):
    # x_ref:     (Kp, S)      bf16   im2col patches of one sample (Kp = pad(27*C_in))
    # w_ref:     (C_out, Kp)  bf16   reshaped (and zero-padded) conv weight
    # b_ref/gamma_ref/beta_ref: (C_out, 1) f32
    # o_ref:     (C_out, S)   f32    normalized output (lane-dense: S lanes)
    acc = jnp.dot(w_ref[...], x_ref[...],
                  preferred_element_type=jnp.float32)          # (C_out, S) f32
    acc = acc + b_ref[...]                                     # bias, (C_out,1) bcast

    # ---- GroupNorm over (channels in group, all spatial) of this sample ----
    if group_size > 1:
        gid_r = jax.lax.broadcasted_iota(jnp.int32, (C_out, C_out), 0) // group_size
        gid_c = jax.lax.broadcasted_iota(jnp.int32, (C_out, C_out), 1) // group_size
        gmat = (gid_r == gid_c).astype(jnp.float32)            # (C_out, C_out)

        def group_reduce(v):                                    # (C_out,1) -> (C_out,1)
            return jnp.dot(gmat, v, preferred_element_type=jnp.float32)
    else:
        def group_reduce(v):
            return v

    count = float(S * group_size)
    ch_sum = jnp.sum(acc, axis=1, keepdims=True)               # (C_out, 1)
    mean = group_reduce(ch_sum) * (1.0 / count)                # group mean per channel
    centered = acc - mean
    ch_ssq = jnp.sum(centered * centered, axis=1, keepdims=True)
    var = group_reduce(ch_ssq) * (1.0 / count)                 # biased var (PyTorch GN)
    inv = jax.lax.rsqrt(var + eps)                             # EUP, free slot

    o_ref[...] = (centered * (inv * gamma_ref[...]) + beta_ref[...]).astype(o_ref.dtype)


def aspp_forward(x_ncdhw, conv_weight, conv_bias, gn_weight, gn_bias,
                 *, rate, num_groups=32, eps=1e-5):
    """Forward of ASPP_module. x_ncdhw: (N, C_in, D, H, W) like PyTorch."""
    N, C_in, D, H, W = x_ncdhw.shape
    C_out = conv_weight.shape[0]
    assert C_out % num_groups == 0, "GroupNorm(32, planes) requires planes % 32 == 0"
    group_size = C_out // num_groups
    S = D * H * W
    K = 27 * C_in
    K_pad = ((K + 127) // 128) * 128          # lane/sublane-aligned contraction dim

    # MXU operands in bf16 (f32 accumulation inside the kernel).
    x_bf = x_ncdhw.astype(jnp.bfloat16)
    w_bf = conv_weight.astype(jnp.bfloat16)

    # Zero-pad spatially in NCDHW: D by 1, H/W by rate (output keeps D,H,W).
    x_pad = jnp.pad(x_bf, ((0, 0), (0, 0), (1, 1), (rate, rate), (rate, rate)))

    # im2col, already transposed: (N, 27*C_in, S); K ordered (kd, kh, kw, c_in).
    taps = []
    for kd in range(3):
        for kh in range(3):
            for kw in range(3):
                taps.append(
                    x_pad[:, :, kd:kd + D,
                          kh * rate:kh * rate + H,
                          kw * rate:kw * rate + W].reshape(N, C_in, S))
    x_col = jnp.concatenate(taps, axis=1)                      # (N, K, S) bf16
    if K_pad != K:
        x_col = jnp.pad(x_col, ((0, 0), (0, K_pad - K), (0, 0)))

    # PyTorch weight (C_out, C_in, 3,3,3) -> (C_out, kd, kh, kw, C_in) -> (C_out, K)
    w_mat = jnp.transpose(w_bf, (0, 2, 3, 4, 1)).reshape(C_out, K)
    if K_pad != K:
        w_mat = jnp.pad(w_mat, ((0, 0), (0, K_pad - K)))

    b2 = conv_bias.reshape(C_out, 1).astype(jnp.float32)
    gamma2 = gn_weight.reshape(C_out, 1).astype(jnp.float32)
    beta2 = gn_bias.reshape(C_out, 1).astype(jnp.float32)

    kernel = functools.partial(_aspp_kernel, C_out=C_out, S=S,
                               group_size=group_size, eps=eps)

    out = pl.pallas_call(
        kernel,
        out_shape=jax.ShapeDtypeStruct((N, C_out, S), jnp.float32),
        grid=(N,),
        in_specs=[
            pl.BlockSpec((None, K_pad, S), lambda n: (n, 0, 0)),   # lane-dense input
            pl.BlockSpec((C_out, K_pad), lambda n: (0, 0)),
            pl.BlockSpec((C_out, 1), lambda n: (0, 0)),
            pl.BlockSpec((C_out, 1), lambda n: (0, 0)),
            pl.BlockSpec((C_out, 1), lambda n: (0, 0)),
        ],
        out_specs=pl.BlockSpec((None, C_out, S), lambda n: (n, 0, 0)),  # lane-dense out
        compiler_params=pltpu.CompilerParams(
            dimension_semantics=("parallel",),
            vmem_limit_bytes=32 * 1024 * 1024),
    )(x_col, w_mat, b2, gamma2, beta2)

    # (N, C_out, S) -> (N, C_out, D, H, W): pure metadata reshape, already NCDHW.
    return out.reshape(N, C_out, D, H, W)


def aspp_reference(x, w, b, gamma, beta, *, rate, num_groups=32, eps=1e-5):
    """Pure-JAX reference (lax conv + GroupNorm) for correctness checking."""
    y = jax.lax.conv_general_dilated(
        x.astype(jnp.float32), w.astype(jnp.float32),
        window_strides=(1, 1, 1),
        padding=((1, 1), (rate, rate), (rate, rate)),
        rhs_dilation=(1, rate, rate),
        dimension_numbers=('NCDHW', 'OIDHW', 'NCDHW'),
        precision=jax.lax.Precision.HIGHEST)
    y = y + b.reshape(1, -1, 1, 1, 1)
    N, C, D, H, W = y.shape
    g = y.reshape(N, num_groups, C // num_groups, D, H, W)
    mean = g.mean(axis=(2, 3, 4, 5), keepdims=True)
    var = g.var(axis=(2, 3, 4, 5), keepdims=True)
    g = (g - mean) / jnp.sqrt(var + eps)
    y = g.reshape(N, C, D, H, W)
    return y * gamma.reshape(1, -1, 1, 1, 1) + beta.reshape(1, -1, 1, 1, 1)


if __name__ == "__main__":
    # Small shapes consistent with the module: inplanes=4, planes=32 (32 GN
    # groups), rate=2, input (N=2, C=4, D=4, H=16, W=16).
    inplanes, planes, rate = 4, 32, 2
    N, D, H, W = 2, 4, 16, 16

    key = jax.random.PRNGKey(0)
    k_x, k_w, k_b = jax.random.split(key, 3)

    x = jax.random.normal(k_x, (N, inplanes, D, H, W), dtype=jnp.float32)

    # Deterministic parameter init (shapes from __init__):
    fan_in = inplanes * 3 * 3 * 3
    # kaiming_normal_ (fan_in, leaky_relu a=0) -> std = sqrt(2 / fan_in)
    conv_weight = jax.random.normal(
        k_w, (planes, inplanes, 3, 3, 3), dtype=jnp.float32) * jnp.sqrt(2.0 / fan_in)
    bound = 1.0 / jnp.sqrt(float(fan_in))
    conv_bias = jax.random.uniform(
        k_b, (planes,), minval=-bound, maxval=bound, dtype=jnp.float32)
    gn_weight = jnp.ones((planes,), jnp.float32)   # GroupNorm affine defaults
    gn_bias = jnp.zeros((planes,), jnp.float32)

    out = aspp_forward(x, conv_weight, conv_bias, gn_weight, gn_bias, rate=rate)
    out = jax.block_until_ready(out)

    # Reference fed the same bf16-rounded operands the kernel feeds the MXU.
    x_r = x.astype(jnp.bfloat16).astype(jnp.float32)
    w_r = conv_weight.astype(jnp.bfloat16).astype(jnp.float32)
    ref = aspp_reference(x_r, w_r, conv_bias, gn_weight, gn_bias, rate=rate)

    assert out.shape == (N, planes, D, H, W)
    err = jnp.max(jnp.abs(out - ref))
    assert jnp.allclose(out, ref, atol=2e-3, rtol=2e-3), f"max abs err = {err}"

    print("KERNEL_OK")
</pallas_src>

<mosaic_0001>
module attributes {stable_mosaic.version = 11 : i64} {
  func.func @_aspp_kernel(%arg0: i32, %arg1: memref<1x128x1024xbf16, #tpu.memory_space<vmem>>, %arg2: memref<32x128xbf16, #tpu.memory_space<vmem>>, %arg3: memref<32x1xf32, #tpu.memory_space<vmem>>, %arg4: memref<32x1xf32, #tpu.memory_space<vmem>>, %arg5: memref<32x1xf32, #tpu.memory_space<vmem>>, %arg6: memref<1x32x1024xf32, #tpu.memory_space<vmem>>) attributes {dimension_semantics = [#tpu.dimension_semantics<parallel>], iteration_bounds = array<i64: 2>, scalar_prefetch = 0 : i64, scratch_operands = 0 : i64, tpu.core_type = #tpu.core_type<tc>, window_params = [{transform_indices = @transform_0, window_bounds = array<i64: 1, 128, 1024>}, {pipeline_mode = #tpu.pipeline_mode<synchronous>, transform_indices = @transform_1, window_bounds = array<i64: 32, 128>}, {pipeline_mode = #tpu.pipeline_mode<synchronous>, transform_indices = @transform_2, window_bounds = array<i64: 32, 1>}, {pipeline_mode = #tpu.pipeline_mode<synchronous>, transform_indices = @transform_3, window_bounds = array<i64: 32, 1>}, {pipeline_mode = #tpu.pipeline_mode<synchronous>, transform_indices = @transform_4, window_bounds = array<i64: 32, 1>}, {transform_indices = @transform_5, window_bounds = array<i64: 1, 32, 1024>}]} {
    %c0 = arith.constant 0 : index
    %c0_0 = arith.constant 0 : index
    %0 = vector.load %arg2[%c0, %c0_0] : memref<32x128xbf16, #tpu.memory_space<vmem>>, vector<32x128xbf16>
    %c0_1 = arith.constant 0 : index
    %c0_2 = arith.constant 0 : index
    %c0_3 = arith.constant 0 : index
    %1 = vector.load %arg1[%c0_1, %c0_2, %c0_3] : memref<1x128x1024xbf16, #tpu.memory_space<vmem>>, vector<1x128x1024xbf16>
    %2 = vector.shape_cast %1 : vector<1x128x1024xbf16> to vector<128x1024xbf16>
    %cst = arith.constant dense<0.000000e+00> : vector<32x1024xf32>
    %3 = tpu.matmul %0, %2, %cst {dimension_numbers = #tpu.dot_dimension_numbers<[1], [0], [0], [1], [0, 0, 1, 1], [], []>} : vector<32x128xbf16>, vector<128x1024xbf16>, vector<32x1024xf32> -> vector<32x1024xf32>
    %c0_4 = arith.constant 0 : index
    %c0_5 = arith.constant 0 : index
    %4 = vector.load %arg3[%c0_4, %c0_5] : memref<32x1xf32, #tpu.memory_space<vmem>>, vector<32x1xf32>
    %5 = vector.broadcast %4 : vector<32x1xf32> to vector<32x1024xf32>
    %6 = arith.addf %3, %5 : vector<32x1024xf32>
    %cst_6 = arith.constant dense<0.000000e+00> : vector<32xf32>
    %7 = vector.multi_reduction <add>, %6, %cst_6 [1] : vector<32x1024xf32> to vector<32xf32>
    %8 = vector.shape_cast %7 : vector<32xf32> to vector<32x1xf32>
    %cst_7 = arith.constant 9.765625E-4 : f32
    %9 = vector.broadcast %cst_7 : f32 to vector<32x1xf32>
    %10 = arith.mulf %8, %9 : vector<32x1xf32>
    %11 = vector.broadcast %10 : vector<32x1xf32> to vector<32x1024xf32>
    %12 = arith.subf %6, %11 : vector<32x1024xf32>
    %13 = arith.mulf %12, %12 : vector<32x1024xf32>
    %cst_8 = arith.constant dense<0.000000e+00> : vector<32xf32>
    %14 = vector.multi_reduction <add>, %13, %cst_8 [1] : vector<32x1024xf32> to vector<32xf32>
    %15 = vector.shape_cast %14 : vector<32xf32> to vector<32x1xf32>
    %cst_9 = arith.constant 9.765625E-4 : f32
    %16 = vector.broadcast %cst_9 : f32 to vector<32x1xf32>
    %17 = arith.mulf %15, %16 : vector<32x1xf32>
    %cst_10 = arith.constant 9.99999974E-6 : f32
    %18 = vector.broadcast %cst_10 : f32 to vector<32x1xf32>
    %19 = arith.addf %17, %18 : vector<32x1xf32>
    %20 = math.rsqrt %19 : vector<32x1xf32>
    %c0_11 = arith.constant 0 : index
    %c0_12 = arith.constant 0 : index
    %21 = vector.load %arg4[%c0_11, %c0_12] : memref<32x1xf32, #tpu.memory_space<vmem>>, vector<32x1xf32>
    %22 = arith.mulf %20, %21 : vector<32x1xf32>
    %23 = vector.broadcast %22 : vector<32x1xf32> to vector<32x1024xf32>
    %24 = arith.mulf %12, %23 : vector<32x1024xf32>
    %c0_13 = arith.constant 0 : index
    %c0_14 = arith.constant 0 : index
    %25 = vector.load %arg5[%c0_13, %c0_14] : memref<32x1xf32, #tpu.memory_space<vmem>>, vector<32x1xf32>
    %26 = vector.broadcast %25 : vector<32x1xf32> to vector<32x1024xf32>
    %27 = arith.addf %24, %26 : vector<32x1024xf32>
    %c0_15 = arith.constant 0 : index
    %c0_16 = arith.constant 0 : index
    %c0_17 = arith.constant 0 : index
    %28 = vector.load %arg6[%c0_15, %c0_16, %c0_17] : memref<1x32x1024xf32, #tpu.memory_space<vmem>>, vector<1x32x1024xf32>
    %29 = vector.shape_cast %28 : vector<1x32x1024xf32> to vector<32x1024xf32>
    %30 = vector.shape_cast %27 : vector<32x1024xf32> to vector<1x32x1024xf32>
    tpu.vector_store %arg6[%c0_15, %c0_16, %c0_17], %30 {strides = array<i32>} : memref<1x32x1024xf32, #tpu.memory_space<vmem>>, vector<1x32x1024xf32>,
    return
  }
  func.func @transform_0(%arg0: i32) -> (i32, i32, i32) {
    %c0_i32 = arith.constant 0 : i32
    %c0_i32_0 = arith.constant 0 : i32
    %c0_i32_1 = arith.constant 0 : i32
    return %arg0, %c0_i32, %c0_i32_0 : i32, i32, i32
  }
  func.func @transform_1(%arg0: i32) -> (i32, i32) {
    %c0_i32 = arith.constant 0 : i32
    %c0_i32_0 = arith.constant 0 : i32
    %c0_i32_1 = arith.constant 0 : i32
    return %c0_i32, %c0_i32_0 : i32, i32
  }
  func.func @transform_2(%arg0: i32) -> (i32, i32) {
    %c0_i32 = arith.constant 0 : i32
    %c0_i32_0 = arith.constant 0 : i32
    %c0_i32_1 = arith.constant 0 : i32
    return %c0_i32, %c0_i32_0 : i32, i32
  }
  func.func @transform_3(%arg0: i32) -> (i32, i32) {
    %c0_i32 = arith.constant 0 : i32
    %c0_i32_0 = arith.constant 0 : i32
    %c0_i32_1 = arith.constant 0 : i32
    return %c0_i32, %c0_i32_0 : i32, i32
  }
  func.func @transform_4(%arg0: i32) -> (i32, i32) {
    %c0_i32 = arith.constant 0 : i32
    %c0_i32_0 = arith.constant 0 : i32
    %c0_i32_1 = arith.constant 0 : i32
    return %c0_i32, %c0_i32_0 : i32, i32
  }
  func.func @transform_5(%arg0: i32) -> (i32, i32, i32) {
    %c0_i32 = arith.constant 0 : i32
    %c0_i32_0 = arith.constant 0 : i32
    %c0_i32_1 = arith.constant 0 : i32
    return %arg0, %c0_i32, %c0_i32_0 : i32, i32, i32
  }
}

</mosaic_0001>

<bundles_post_ra>
// kernel: tpu_custom_call.1
= control target key start
LH: loop header
LB: loop body
LE: loop exit
PB: predicated region body
PF: predicated region fallthrough
CT: control target
= control target key end

     0   :  { %10 = vsyncpa [#allocation3], 0  ;;  %s2175_s0 = inlined_call_operand.hbm [shape: bf16[2,128,1024], index: 0, kind: input, shape index: {}]   ;;  %s2176_s1 = inlined_call_operand.vmem [shape: bf16[32,128], index: 1, kind: input, shape index: {}]   ;;  %s2177_s2 = inlined_call_operand.vmem [shape: f32[32,1], index: 2, kind: input, shape index: {}]   ;;  %s2178_s3 = inlined_call_operand.vmem [shape: f32[32,1], index: 3, kind: input, shape index: {}]   ;;  %s2179_s4 = inlined_call_operand.vmem [shape: f32[32,1], index: 4, kind: input, shape index: {}]   ;;  %s2180_s5 = inlined_call_operand.hbm [shape: f32[2,32,1024], index: 5, kind: output, shape index: {}]  }
   0x1   :  { %12 = vsyncpa [#allocation3 + $0x1], 0 }
   0x2   :  { %13 = vsyncpa [#allocation4], 0 }
   0x3   :  { %15 = vsyncpa [#allocation4 + $0x1], 0  ;;  %s1547_s18 = smov 0   ;;  %s1549_s19 = smov 0  }
   0x4   :  { %s1551_s20 = smov 0   ;;  %s1553_s21 = smov 0  }
   0x5 LB: > { %s1568_s22 = sadd.s32 4294967295, %s1508_s21   ;;  %s1267_s23 = sadd.s32 4294967294, %s1508_s21   ;;  %s1508_s21 = sphi %s1553_s21, %s2193_s21   ;;  %s1504_s20 = sphi %s1551_s20, %s2192_s20   ;;  %s1500_s19 = sphi %s1549_s19, %s2191_s19   ;;  %s1496_s18 = sphi %s1547_s18, %s2190_s18  }
   0x6   : > { %s1572_s24 = sadd.s32 1, %s1508_s21   ;;  %s28_s25 = sadd.s32 1, %s1504_s20 }
   0x7   : > { %s25_s26 = ssub.s32 %s1508_s21, %s1572_s24  ;;  %p35_p0 = scmp.ne.s32.totalorder %s1504_s20, %s1500_s19 }
   0x8   : > { %p26_p1 = scmp.eq.s32.totalorder %s25_s26, 0  ;;  %p36_p2 = scmp.eq.s32.totalorder %s1508_s21, 0 }
   0x9   : > { %p41_p3 = scmp.ne.s32.totalorder %s1500_s19, %s1496_s18  ;;  %p42_p4 = scmp.eq.s32.totalorder %s1568_s22, 0 }
   0xa   : > { %s1584_s27 = scalar_select %p26_p1, %s1504_s20, %s28_s25  }
   0xb   : > { %p1586_p5 = por %p36_p2, %p35_p0  ;;  %p1590_p6 = por %p42_p4, %p41_p3 }
   0xc   : > { %p149_p7 = scmp.eq.s32.totalorder %s1568_s22, 1  ;;  %p155_p8 = scmp.eq.s32.totalorder %s1267_s23, 1 }
   0xd   : > { %p1361_p10 = scmp.lt.s32.totalorder %s1508_s21, 2  ;;  %s187_s7 = sand.u32 1, %s1504_s20  }
   0xe   : > { %p1597_p11 = por %p149_p7, %p35_p0  ;;  %p1601_p12 = por %p155_p8, %p41_p3 }
   0xf   : > { %s1347_s8 = sshll.u32 %s1508_s21, 13  ;;  %s1270_s9 = sshll.u32 %s187_s7, 9 }
  0x10   : > { %s2184_s30 = scalar_select %p1597_p11, 1, 0 }
  0x11   : > { %s2185_s6 = scalar_select %p1601_p12, 1, 0 }
  0x12   : > { %s1610_s12 = scalar_lea.hbm %s2175_s0, %s1347_s8  ;;  %s191_s13 = scalar_lea.vmem [#allocation2], %s1270_s9 }
  0x13   : > { %s198_s14 = sshll.u32 %s191_s13, 4  ;;  %p1614_p13 = pnand %p1361_p10, %p1586_p5  ;;  %s1618_s14 = int_to_ptr.vmem [resolvable:$true] %s198_s14 }
  0x14   : > { %s1620_s16 = scalar_lea.sflag [#allocation3], %s187_s7  ;;  %s1412_s17 = scalar_lea.hbm %s1610_s12, 8192 }
  0x15   : > { %p1413_p0 = scmp.ne.s32.totalorder %s1610_s12, %s1412_s17  ;;  %p1414_p1 = pneg %p1614_p13 }
  0x16   : > { %s1417_s26 = scalar_lea.hbm %s2175_s0, 16384  ;;  %p1418_p4 = scmp.lt.u32.totalorder %s1610_s12, %s2175_s0 }
  0x17   : > { %p1415_p2 = pnand %p1414_p1, %p1413_p0  ;;  %p1419_p5 = scmp.lt.u32.totalorder %s1417_s26, %s1412_s17 }
  0x18   : > { %p1421_p8 = scmp.lt.u32.totalorder %s1412_s17, %s1610_s12 }
  0x19   : > { %p1416_p3 = pneg %p1415_p2  ;;  %p1420_p7 = por %p1419_p5, %p1418_p4 }
  0x1b   : > { %p1422_p10 = por %p1421_p8, %p1420_p7 }
  0x1d   : > { %p1423_p9 = pnand %p1422_p10, %p1416_p3 }
  0x1f   : > { %1426 = shalt.err (!%p1423_p9)
}
  0x20   : > { %s1427_s7 = scalar_lea.vmem %s1618_s14, 8192  ;;  %s1510_s9 = smov [#allocation2]  }
  0x21   : > { %p1428_p0 = scmp.ne.s32.totalorder %s1618_s14, %s1427_s7  ;;  %s1432_s10 = sshll.u32 %s1510_s9, 4  ;;  %s1433_s10 = int_to_ptr.vmem [resolvable:$false] %s1432_s10 }
  0x22   : > { %s1434_s11 = scalar_lea.vmem %s1433_s10, 16384  ;;  %p1435_p11 = scmp.lt.s32.totalorder %s1618_s14, %s1433_s10 }
  0x23   : > { %p1430_p2 = pnand %p1428_p0, %p1414_p1  ;;  %p1436_p4 = scmp.lt.s32.totalorder %s1434_s11, %s1427_s7 }
  0x25   : > { %p1431_p12 = pneg %p1430_p2  ;;  %p1437_p5 = por %p1436_p4, %p1435_p11 }
  0x27   : > { %p1438_p7 = pnand %p1437_p5, %p1431_p12 }
  0x29   : > { %1441 = shalt.err (!%p1438_p7)
}
  0x2a   : > { %s1511_s13 = smov 512   ;;  %s1512_s17 = smov 32  }
  0x2b   : > { %1356 = dma.hbm_to_vmem [thread:$0]  (!%p1614_p13), %s1610_s12, 8192, %s1618_s14, %s1620_s16, %s1511_s13, %s1511_s13, %s1512_s17  }
  0x2c   : > { %p1273_p9 = scmp.ge.s32.totalorder %s1508_s21, 1  ;;  %p206_p1 = scmp.lt.s32.totalorder %s1508_s21, 3 }
  0x2e   : > { %p207_p3 = pnand %p1273_p9, %p206_p1 }
  0x2f   : > { %s1651_s23 = sand.u32 (!%p207_p3), 1, %s1500_s19  }
  0x30   : > { %210 = sbr.rel (%p207_p3) target bundleno = 832 (0x340), region = 40  ;;  %s1274_s25 = sshll.u32 (!%p207_p3), %s1651_s23, 9 }
  0x31   : > { %s213_s26 = scalar_lea.sflag (!%p207_p3), [#allocation3], %s1651_s23  ;;  %s1655_s28 = scalar_lea.vmem (!%p207_p3), [#allocation2], %s1274_s25 }
  0x37   : > { %1487 = dma.done.wait (%p1590_p6), %s213_s26, 8192  }
  0x38   : > { %1489 = vsyncadd (%p1590_p6), %s213_s26, 4294959104  ;;  %v1513_v0 = vmov 0   ;;  %v248_v1 = vld [vmem:[%s1655_s28] sm:$0xff]  ;;  %v249_v3 = vld [vmem:[%s1655_s28 + $0x8] sm:$0xff]  ;;  %s1275_s26 = sshll.u32 %s1651_s23, 8  ;;  %s1348_s29 = sshll.u32 %s1568_s22, 12 }
  0x39   : > { %700 = vmatprep.mubr.bf16.mxu0 %v1513_v0  ;;  %753 = vmatprep.mubr.bf16.mxu1 %v1513_v0  ;;  %v252_v2 = vld [vmem:[%s1655_s28 + $0x20] sm:$0xff]  ;;  %v253_v5 = vld [vmem:[%s1655_s28 + $0x28] sm:$0xff]  ;;  %v314_v61 = vld [vmem:[%s2177_s2 + $0x10] sm:$0xff]  ;;  %s2121_s15 = scalar_lea.hbm %s2180_s5, %s1348_s29  ;;  %s1181_s16 = scalar_lea.sflag [#allocation4], %s1651_s23 }
  0x3a   : > { %1400 = vset.pattern.permute.xlu0 %v1513_v0  ;;  %1401 = vset.pattern.permute.xlu1 %v1513_v0  ;;  %v1279_v4 = vcombine.high %v248_v1, %v252_v2  ;;  %v1278_v6 = vcombine.low %v248_v1, %v252_v2  ;;  %v256_v7 = vld [vmem:[%s1655_s28 + $0x40] sm:$0xff]  ;;  %v1281_v9 = vcombine.high %v249_v3, %v253_v5  ;;  %v257_v12 = vld [vmem:[%s1655_s28 + $0x48] sm:$0xff]  ;;  %p2187_p11 = scmp.ne.s32.totalorder %s2184_s30, 0  ;;  %s1514_s7 = smov [#allocation5]  }
  0x3b   : > { %v260_v8 = vld [vmem:[%s1655_s28 + $0x60] sm:$0xff]  ;;  %v1280_v10 = vcombine.low %v249_v3, %v253_v5  ;;  %v261_v13 = vld [vmem:[%s1655_s28 + $0x68] sm:$0xff]  ;;  %v250_v3 = vld [vmem:[%s1655_s28 + $0x10] sm:$0xff]  ;;  %328 = vperm.xlu1 %1401, %v314_v61   ;;  %s1446_s9 = sshll.u32 %s1514_s7, 4  ;;  %s1447_s9 = int_to_ptr.vmem [resolvable:$false] %s1446_s9 }
  0x3c   : > { %v1287_v11 = vcombine.high %v256_v7, %v260_v8  ;;  %v264_v14 = vld [vmem:[%s1655_s28 + $0x80] sm:$0xff]  ;;  %668 = vmatprep.subr.bf16.mxu0 %v1279_v4  ;;  %v1289_v15 = vcombine.high %v257_v12, %v261_v13  ;;  %v265_v17 = vld [vmem:[%s1655_s28 + $0x88] sm:$0xff]  ;;  %721 = vmatprep.subr.bf16.mxu1 %v1281_v9  ;;  %v1286_v19 = vcombine.low %v256_v7, %v260_v8  ;;  %v254_v4 = vld [vmem:[%s1655_s28 + $0x30] sm:$0xff]  ;;  %s1448_s10 = scalar_lea.vmem %s1447_s9, 8192 }
  0x3d   : > { %v268_v16 = vld [vmem:[%s1655_s28 + $0xa0] sm:$0xff]  ;;  %v269_v18 = vld [vmem:[%s1655_s28 + $0xa8] sm:$0xff]  ;;  %669 = vmatpush1.bf16.msra.mxu0 %v1278_v6  ;;  %722 = vmatpush1.bf16.msra.mxu1 %v1280_v10  ;;  %v1288_v20 = vcombine.low %v257_v12, %v261_v13  ;;  %v251_v5 = vld [vmem:[%s1655_s28 + $0x18] sm:$0xff]  ;;  %v1283_v10 = vcombine.high %v250_v3, %v254_v4 }
  0x3e   : > { %670 = vmatprep.subr.bf16.mxu0 %v1287_v11  ;;  %v1295_v21 = vcombine.high %v264_v14, %v268_v16  ;;  %723 = vmatprep.subr.bf16.mxu1 %v1289_v15  ;;  %v1297_v22 = vcombine.high %v265_v17, %v269_v18  ;;  %v272_v23 = vld [vmem:[%s1655_s28 + $0xc0] sm:$0xff]  ;;  %v273_v25 = vld [vmem:[%s1655_s28 + $0xc8] sm:$0xff]  ;;  %v1294_v27 = vcombine.low %v264_v14, %v268_v16  ;;  %v255_v6 = vld [vmem:[%s1655_s28 + $0x38] sm:$0xff] }
  0x3f   : > { %v276_v24 = vld [vmem:[%s1655_s28 + $0xe0] sm:$0xff]  ;;  %v277_v26 = vld [vmem:[%s1655_s28 + $0xe8] sm:$0xff]  ;;  %v1296_v28 = vcombine.low %v265_v17, %v269_v18  ;;  %v315_v7 = vld [vmem:[%s2177_s2 + $0x18] sm:$0xff]  ;;  %v1285_v11 = vcombine.high %v251_v5, %v255_v6  ;;  %v1282_v17 = vcombine.low %v250_v3, %v254_v4  ;;  %v1284_v18 = vcombine.low %v251_v5, %v255_v6 }
  0x40   : > { %v1303_v29 = vcombine.high %v272_v23, %v276_v24  ;;  %v1305_v30 = vcombine.high %v273_v25, %v277_v26  ;;  %v280_v31 = vld [vmem:[%s1655_s28 + $0x100] sm:$0xff]  ;;  %v281_v33 = vld [vmem:[%s1655_s28 + $0x108] sm:$0xff]  ;;  %v1302_v35 = vcombine.low %v272_v23, %v276_v24  ;;  %v1304_v36 = vcombine.low %v273_v25, %v277_v26  ;;  %v258_v12 = vld [vmem:[%s1655_s28 + $0x50] sm:$0xff]  ;;  %333 = vperm.xlu1 %1401, %v315_v7  }
  0x41   : > { %671 = vmatpush1.bf16.msra.mxu0 %v1286_v19  ;;  %724 = vmatpush1.bf16.msra.mxu1 %v1288_v20  ;;  %v284_v32 = vld [vmem:[%s1655_s28 + $0x120] sm:$0xff]  ;;  %v285_v34 = vld [vmem:[%s1655_s28 + $0x128] sm:$0xff]  ;;  %v262_v13 = vld [vmem:[%s1655_s28 + $0x70] sm:$0xff] }
  0x42   : > { %672 = vmatprep.subr.bf16.mxu0 %v1295_v21  ;;  %725 = vmatprep.subr.bf16.mxu1 %v1297_v22  ;;  %v1311_v37 = vcombine.high %v280_v31, %v284_v32  ;;  %v1313_v38 = vcombine.high %v281_v33, %v285_v34  ;;  %v288_v39 = vld [vmem:[%s1655_s28 + $0x140] sm:$0xff]  ;;  %v289_v41 = vld [vmem:[%s1655_s28 + $0x148] sm:$0xff]  ;;  %v1310_v43 = vcombine.low %v280_v31, %v284_v32  ;;  %v259_v15 = vld [vmem:[%s1655_s28 + $0x58] sm:$0xff] }
  0x43   : > { %v292_v40 = vld [vmem:[%s1655_s28 + $0x160] sm:$0xff]  ;;  %v293_v42 = vld [vmem:[%s1655_s28 + $0x168] sm:$0xff]  ;;  %v1312_v44 = vcombine.low %v281_v33, %v285_v34  ;;  %v263_v16 = vld [vmem:[%s1655_s28 + $0x78] sm:$0xff]  ;;  %v1291_v19 = vcombine.high %v258_v12, %v262_v13  ;;  %v1290_v25 = vcombine.low %v258_v12, %v262_v13 }
  0x44   : > { %v1319_v45 = vcombine.high %v288_v39, %v292_v40  ;;  %v1321_v46 = vcombine.high %v289_v41, %v293_v42  ;;  %v296_v47 = vld [vmem:[%s1655_s28 + $0x180] sm:$0xff]  ;;  %v297_v49 = vld [vmem:[%s1655_s28 + $0x188] sm:$0xff]  ;;  %v1318_v51 = vcombine.low %v288_v39, %v292_v40  ;;  %v1320_v52 = vcombine.low %v289_v41, %v293_v42  ;;  %v266_v21 = vld [vmem:[%s1655_s28 + $0x90] sm:$0xff] }
  0x45   : > { %673 = vmatpush1.bf16.msra.mxu0 %v1294_v27  ;;  %726 = vmatpush1.bf16.msra.mxu1 %v1296_v28  ;;  %v300_v48 = vld [vmem:[%s1655_s28 + $0x1a0] sm:$0xff]  ;;  %v301_v50 = vld [vmem:[%s1655_s28 + $0x1a8] sm:$0xff]  ;;  %v1293_v20 = vcombine.high %v259_v15, %v263_v16  ;;  %v270_v22 = vld [vmem:[%s1655_s28 + $0xb0] sm:$0xff]  ;;  %v1292_v26 = vcombine.low %v259_v15, %v263_v16 }
  0x46   : > { %674 = vmatprep.subr.bf16.mxu0 %v1303_v29  ;;  %727 = vmatprep.subr.bf16.mxu1 %v1305_v30  ;;  %v1327_v53 = vcombine.high %v296_v47, %v300_v48  ;;  %v1329_v54 = vcombine.high %v297_v49, %v301_v50  ;;  %v304_v55 = vld [vmem:[%s1655_s28 + $0x1c0] sm:$0xff]  ;;  %v305_v57 = vld [vmem:[%s1655_s28 + $0x1c8] sm:$0xff]  ;;  %v1326_v60 = vcombine.low %v296_v47, %v300_v48  ;;  %v267_v23 = vld [vmem:[%s1655_s28 + $0x98] sm:$0xff] }
  0x47   : > { %v308_v56 = vld [vmem:[%s1655_s28 + $0x1e0] sm:$0xff]  ;;  %v309_v58 = vld [vmem:[%s1655_s28 + $0x1e8] sm:$0xff]  ;;  %v1328_v62 = vcombine.low %v297_v49, %v301_v50  ;;  %v271_v24 = vld [vmem:[%s1655_s28 + $0xb8] sm:$0xff]  ;;  %v1299_v27 = vcombine.high %v266_v21, %v270_v22  ;;  %v1298_v34 = vcombine.low %v266_v21, %v270_v22 }
  0x48   : > { %v312_v59 = vld [vmem:[%s2177_s2] sm:$0xff]  ;;  %v1335_v63 = vcombine.high %v304_v55, %v308_v56  ;;  %v313_v1 = vld [vmem:[%s2177_s2 + $0x8] sm:$0xff]  ;;  %v1337_v2 = vcombine.high %v305_v57, %v309_v58  ;;  %v1334_v8 = vcombine.low %v304_v55, %v308_v56  ;;  %v1336_v9 = vcombine.low %v305_v57, %v309_v58  ;;  %v274_v29 = vld [vmem:[%s1655_s28 + $0xd0] sm:$0xff] }
  0x49   : > { %675 = vmatpush1.bf16.msra.mxu0 %v1302_v35  ;;  %728 = vmatpush1.bf16.msra.mxu1 %v1304_v36  ;;  %v1718_v14 = vld [vmem:[%s2176_s1] sm:$0xff]   ;;  %v1301_v28 = vcombine.high %v267_v23, %v271_v24  ;;  %v278_v30 = vld [vmem:[%s1655_s28 + $0xf0] sm:$0xff]  ;;  %v275_v31 = vld [vmem:[%s1655_s28 + $0xd8] sm:$0xff]  ;;  %v1300_v35 = vcombine.low %v267_v23, %v271_v24 }
  0x4a   : > { %676 = vmatprep.subr.bf16.mxu0 %v1311_v37  ;;  %729 = vmatprep.subr.bf16.mxu1 %v1313_v38  ;;  %v279_v32 = vld [vmem:[%s1655_s28 + $0xf8] sm:$0xff]  ;;  %v1736_v33 = vld [vmem:[%s2176_s1 + $0x8] sm:$0xff]   ;;  %v1307_v36 = vcombine.high %v274_v29, %v278_v30  ;;  %v282_v38 = vld [vmem:[%s1655_s28 + $0x110] sm:$0xff]  ;;  %v1306_v42 = vcombine.low %v274_v29, %v278_v30 }
  0x4b   : > { %318 = vperm.xlu0 %1400, %v312_v59   ;;  %v1309_v37 = vcombine.high %v275_v31, %v279_v32  ;;  %v286_v39 = vld [vmem:[%s1655_s28 + $0x130] sm:$0xff]  ;;  %v283_v40 = vld [vmem:[%s1655_s28 + $0x118] sm:$0xff] }
  0x4c   : > { %v287_v41 = vld [vmem:[%s1655_s28 + $0x138] sm:$0xff]  ;;  %v294_v47 = vld [vmem:[%s1655_s28 + $0x170] sm:$0xff]  ;;  %v1314_v50 = vcombine.low %v282_v38, %v286_v39 }
  0x4d   : > { %677 = vmatpush1.bf16.msra.mxu0 %v1310_v43  ;;  %730 = vmatpush1.bf16.msra.mxu1 %v1312_v44  ;;  %v1308_v43 = vcombine.low %v275_v31, %v279_v32  ;;  %v1315_v44 = vcombine.high %v282_v38, %v286_v39  ;;  %v291_v48 = vld [vmem:[%s1655_s28 + $0x158] sm:$0xff]  ;;  %v302_v55 = vld [vmem:[%s1655_s28 + $0x1b0] sm:$0xff] }
  0x4e   : > { %678 = vmatprep.subr.bf16.mxu0 %v1319_v45  ;;  %731 = vmatprep.subr.bf16.mxu1 %v1321_v46  ;;  %v1317_v45 = vcombine.high %v283_v40, %v287_v41  ;;  %v290_v46 = vld [vmem:[%s1655_s28 + $0x150] sm:$0xff]  ;;  %v295_v49 = vld [vmem:[%s1655_s28 + $0x178] sm:$0xff] }
  0x4f   : > { %323 = vperm.xlu0 %1400, %v313_v1   ;;  %v299_v56 = vld [vmem:[%s1655_s28 + $0x198] sm:$0xff]  ;;  %v1322_v58 = vcombine.low %v290_v46, %v294_v47  ;;  %v1324_v59 = vcombine.low %v291_v48, %v295_v49 }
  0x50   : > { %v303_v57 = vld [vmem:[%s1655_s28 + $0x1b8] sm:$0xff] }
  0x51   : > { %679 = vmatpush1.bf16.msra.mxu0 %v1318_v51  ;;  %732 = vmatpush1.bf16.msra.mxu1 %v1320_v52  ;;  %v1316_v51 = vcombine.low %v283_v40, %v287_v41  ;;  %v1323_v52 = vcombine.high %v290_v46, %v294_v47  ;;  %v1333_v61 = vcombine.high %v299_v56, %v303_v57  ;;  %v307_v1 = vld [vmem:[%s1655_s28 + $0x1d8] sm:$0xff] }
  0x52   : > { %680 = vmatprep.subr.bf16.mxu0 %v1327_v53  ;;  %733 = vmatprep.subr.bf16.mxu1 %v1329_v54  ;;  %v1325_v53 = vcombine.high %v291_v48, %v295_v49  ;;  %v298_v54 = vld [vmem:[%s1655_s28 + $0x190] sm:$0xff]  ;;  %v1332_v4 = vcombine.low %v299_v56, %v303_v57 }
  0x53   : > { %v1330_v3 = vcombine.low %v298_v54, %v302_v55 }
  0x55   : > { %681 = vmatpush1.bf16.msra.mxu0 %v1326_v60  ;;  %734 = vmatpush1.bf16.msra.mxu1 %v1328_v62  ;;  %v1331_v60 = vcombine.high %v298_v54, %v302_v55  ;;  %v306_v62 = vld [vmem:[%s1655_s28 + $0x1d0] sm:$0xff] }
  0x56   : > { %682 = vmatprep.subr.bf16.mxu0 %v1335_v63  ;;  %735 = vmatprep.subr.bf16.mxu1 %v1337_v2  ;;  %v310_v63 = vld [vmem:[%s1655_s28 + $0x1f0] sm:$0xff]  ;;  %v311_v2 = vld [vmem:[%s1655_s28 + $0x1f8] sm:$0xff]  ;;  %s2066_s28 = scalar_lea.vmem [#allocation5], %s1275_s26 }
  0x57   : > { %v1339_v5 = vcombine.high %v306_v62, %v310_v63  ;;  %v1341_v6 = vcombine.high %v307_v1, %v311_v2  ;;  %v1338_v7 = vcombine.low %v306_v62, %v310_v63  ;;  %s1194_s12 = sshll.u32 %s2066_s28, 4  ;;  %s2123_s12 = int_to_ptr.vmem [resolvable:$true] %s1194_s12 }
  0x58   : > { %s1442_s8 = scalar_lea.vmem %s2123_s12, 4096  ;;  %p1449_p8 = scmp.lt.s32.totalorder %s2123_s12, %s1447_s9 }
  0x59   : > { %683 = vmatpush1.bf16.msra.mxu0 %v1334_v8  ;;  %736 = vmatpush1.bf16.msra.mxu1 %v1336_v9  ;;  %v1340_v8 = vcombine.low %v307_v1, %v311_v2  ;;  %p1443_p6 = scmp.ne.s32.totalorder %s2123_s12, %s1442_s8  ;;  %p1450_p10 = scmp.lt.s32.totalorder %s1448_s10, %s1442_s8 }
  0x5a   : > { %774 = vmatprep.subr.bf16.mxu0 %v1283_v10  ;;  %827 = vmatprep.subr.bf16.mxu1 %v1285_v11 }
  0x5b   : > { %p1444_p12 = pnand %p1443_p6, %p2187_p11  ;;  %p1451_p0 = por %p1450_p10, %p1449_p8 }
  0x5c   : > { %701 = vmatmul.mubr.bf16.vlgmr.msra.gmra.mrb[0].mxu0 %v1718_v14  ;;  %754 = vmatmul.mubr.bf16.vlgmr.msra.gmra.mrb[0].mxu1 %v1718_v14 }
  0x5d   : > { %775 = vmatpush1.bf16.msra.mxu0 %v1282_v17  ;;  %828 = vmatpush1.bf16.msra.mxu1 %v1284_v18  ;;  %p1445_p13 = pneg %p1444_p12 }
  0x5e   : > { %776 = vmatprep.subr.bf16.mxu0 %v1291_v19  ;;  %829 = vmatprep.subr.bf16.mxu1 %v1293_v20 }
  0x5f   : > { %710 = vmatprep.mubr.bf16.mxu0 %v1513_v0  ;;  %763 = vmatprep.mubr.bf16.mxu1 %v1513_v0  ;;  %p1452_p2 = pnand %p1451_p0, %p1445_p13 }
  0x61   : > { %777 = vmatpush1.bf16.msra.mxu0 %v1290_v25  ;;  %830 = vmatpush1.bf16.msra.mxu1 %v1292_v26 }
  0x62   : > { %778 = vmatprep.subr.bf16.mxu0 %v1299_v27  ;;  %831 = vmatprep.subr.bf16.mxu1 %v1301_v28 }
  0x64   : > { %711 = vmatmul.mubr.bf16.gmra.mrb[4].mxu0 %v1736_v33  ;;  %764 = vmatmul.mubr.bf16.gmra.mrb[4].mxu1 %v1736_v33 }
  0x65   : > { %779 = vmatpush1.bf16.msra.mxu0 %v1298_v34  ;;  %832 = vmatpush1.bf16.msra.mxu1 %v1300_v35 }
  0x66   : > { %780 = vmatprep.subr.bf16.mxu0 %v1307_v36  ;;  %833 = vmatprep.subr.bf16.mxu1 %v1309_v37 }
  0x67   : > { %806 = vmatprep.mubr.bf16.mxu0 %v1513_v0  ;;  %859 = vmatprep.mubr.bf16.mxu1 %v1513_v0 }
  0x69   : > { %781 = vmatpush1.bf16.msra.mxu0 %v1306_v42  ;;  %834 = vmatpush1.bf16.msra.mxu1 %v1308_v43 }
  0x6a   : > { %782 = vmatprep.subr.bf16.mxu0 %v1315_v44  ;;  %835 = vmatprep.subr.bf16.mxu1 %v1317_v45 }
  0x6d   : > { %783 = vmatpush1.bf16.msra.mxu0 %v1314_v50  ;;  %836 = vmatpush1.bf16.msra.mxu1 %v1316_v51 }
  0x6e   : > { %784 = vmatprep.subr.bf16.mxu0 %v1323_v52  ;;  %837 = vmatprep.subr.bf16.mxu1 %v1325_v53 }
  0x71   : > { %785 = vmatpush1.bf16.msra.mxu0 %v1322_v58  ;;  %838 = vmatpush1.bf16.msra.mxu1 %v1324_v59 }
  0x72   : > { %786 = vmatprep.subr.bf16.mxu0 %v1331_v60  ;;  %839 = vmatprep.subr.bf16.mxu1 %v1333_v61 }
  0x75   : > { %787 = vmatpush1.bf16.msra.mxu0 %v1330_v3  ;;  %840 = vmatpush1.bf16.msra.mxu1 %v1332_v4 }
  0x76   : > { %788 = vmatprep.subr.bf16.mxu0 %v1339_v5  ;;  %841 = vmatprep.subr.bf16.mxu1 %v1341_v6 }
  0x79   : > { %789 = vmatpush1.bf16.msra.mxu0 %v1338_v7  ;;  %842 = vmatpush1.bf16.msra.mxu1 %v1340_v8 }
  0x7c   : > { %807 = vmatmul.mubr.bf16.vlgmr.msra.gmra.mrb[8].mxu0 %v1718_v14  ;;  %860 = vmatmul.mubr.bf16.vlgmr.msra.gmra.mrb[8].mxu1 %v1718_v14 }
  0x7d   : > { %816 = vmatprep.mubr.bf16.mxu0 %v1513_v0  ;;  %869 = vmatprep.mubr.bf16.mxu1 %v1513_v0 }
  0x84   : > { %817 = vmatmul.mubr.bf16.gmra.mrb[12].mxu0 %v1736_v33  ;;  %870 = vmatmul.mubr.bf16.gmra.mrb[12].mxu1 %v1736_v33 }
  0xba   : > { %v1769_v28 = vpop.permute.xlu1 %328 }
  0xbf   : > { %v1783_v35 = vpop.permute.xlu1 %333 }
  0xca   : > { %v319_v24 = vpop.permute.xlu0 %318 }
  0xce   : > { %v324_v25 = vpop.permute.xlu0 %323 }
 0x12f   : > { %v702_v9 = vpop.f32.mrb[0].mxu0  ;;  %v755_v11 = vpop.f32.mrb[0].mxu1 }
 0x130   : > { %v704_v10 = vpop.f32.mrb[1].mxu0  ;;  %v757_v13 = vpop.f32.mrb[1].mxu1  ;;  %v1765_v26 = vadd.f32 %v702_v9, %v319_v24  ;;  %v1777_v32 = vadd.f32 %v755_v11, %v319_v24 }
 0x131   : > { %v706_v12 = vpop.f32.mrb[2].mxu0  ;;  %v759_v16 = vpop.f32.mrb[2].mxu1  ;;  %v1767_v27 = vadd.f32 %v704_v10, %v319_v24  ;;  %v1792_v39 = vadd.f32 %v757_v13, %v319_v24 }
 0x132   : > { %v708_v15 = vpop.f32.mrb[3].mxu0  ;;  %v761_v17 = vpop.f32.mrb[3].mxu1  ;;  %v1771_v29 = vadd.f32 %v706_v12, %v324_v25  ;;  %v1781_v34 = vadd.f32 %v759_v16, %v324_v25 }
 0x133   : > { %v1773_v30 = vadd.f32 %v708_v15, %v324_v25  ;;  %v880_v31 = vadd.f32 %v1767_v27, %v1765_v26  ;;  %v1807_v47 = vadd.f32 %v761_v17, %v324_v25 }
 0x135   : > { %v889_v33 = vadd.f32 %v1773_v30, %v1771_v29  ;;  %v881_v38 = vadd.f32 %v880_v31, %v1777_v32 }
 0x137   : > { %v712_v18 = vpop.f32.mrb[4].mxu0  ;;  %v765_v20 = vpop.f32.mrb[4].mxu1  ;;  %v890_v42 = vadd.f32 %v889_v33, %v1781_v34  ;;  %v882_v46 = vadd.f32 %v881_v38, %v1792_v39 }
 0x138   : > { %v714_v19 = vpop.f32.mrb[5].mxu0  ;;  %v767_v21 = vpop.f32.mrb[5].mxu1  ;;  %v1786_v36 = vadd.f32 %v712_v18, %v1769_v28  ;;  %v1804_v44 = vadd.f32 %v765_v20, %v1769_v28 }
 0x139   : > { %v716_v14 = vpop.f32.mrb[6].mxu0  ;;  %v769_v23 = vpop.f32.mrb[6].mxu1  ;;  %v1789_v37 = vadd.f32 %v714_v19, %v1769_v28  ;;  %v891_v56 = vadd.f32 %v890_v42, %v1807_v47  ;;  %v1824_v62 = vadd.f32 %v767_v21, %v1769_v28 }
 0x13a   : > { %v718_v22 = vpop.f32.mrb[7].mxu0  ;;  %v771_v0 = vpop.f32.mrb[7].mxu1  ;;  %v1795_v40 = vadd.f32 %v716_v14, %v1783_v35  ;;  %v1814_v52 = vadd.f32 %v769_v23, %v1783_v35 }
 0x13b   : > { %v1798_v41 = vadd.f32 %v718_v22, %v1783_v35  ;;  %v898_v43 = vadd.f32 %v1789_v37, %v1786_v36  ;;  %v1832_v6 = vadd.f32 %v771_v0, %v1783_v35 }
 0x13d   : > { %v907_v51 = vadd.f32 %v1798_v41, %v1795_v40  ;;  %v899_v61 = vadd.f32 %v898_v43, %v1804_v44 }
 0x13f   : > { %v908_v5 = vadd.f32 %v907_v51, %v1814_v52  ;;  %v900_v11 = vadd.f32 %v899_v61, %v1824_v62 }
 0x141   : > { %v909_v22 = vadd.f32 %v908_v5, %v1832_v6 }
 0x14f   : > { %v808_v45 = vpop.f32.mrb[8].mxu0  ;;  %v861_v49 = vpop.f32.mrb[8].mxu1 }
 0x150   : > { %v1809_v48 = vadd.f32 %v808_v45, %v319_v24  ;;  %v810_v50 = vpop.f32.mrb[9].mxu0  ;;  %v863_v54 = vpop.f32.mrb[9].mxu1  ;;  %v862_v2 = vadd.f32 %v861_v49, %v319_v24 }
 0x151   : > { %v1816_v53 = vadd.f32 %v810_v50, %v319_v24  ;;  %v812_v55 = vpop.f32.mrb[10].mxu0  ;;  %v865_v59 = vpop.f32.mrb[10].mxu1  ;;  %v864_v7 = vadd.f32 %v863_v54, %v319_v24 }
 0x152   : > { %v883_v57 = vadd.f32 %v882_v46, %v1809_v48  ;;  %v1820_v58 = vadd.f32 %v812_v55, %v324_v25  ;;  %v814_v60 = vpop.f32.mrb[11].mxu0  ;;  %v867_v1 = vpop.f32.mrb[11].mxu1  ;;  %v1834_v8 = vadd.f32 %v865_v59, %v324_v25 }
 0x153   : > { %v1826_v63 = vadd.f32 %v814_v60, %v324_v25  ;;  %v1838_v13 = vadd.f32 %v867_v1, %v324_v25 }
 0x154   : > { %v884_v3 = vadd.f32 %v883_v57, %v1816_v53  ;;  %v892_v4 = vadd.f32 %v891_v56, %v1820_v58 }
 0x156   : > { %v893_v9 = vadd.f32 %v892_v4, %v1826_v63  ;;  %v885_v10 = vadd.f32 %v884_v3, %v862_v2 }
 0x157   : > { %v818_v12 = vpop.f32.mrb[12].mxu0  ;;  %v871_v16 = vpop.f32.mrb[12].mxu1 }
 0x158   : > { %v1841_v15 = vadd.f32 %v818_v12, %v1769_v28  ;;  %v820_v17 = vpop.f32.mrb[13].mxu0  ;;  %v886_v18 = vadd.f32 %v885_v10, %v864_v7  ;;  %v894_v19 = vadd.f32 %v893_v9, %v1834_v8  ;;  %v873_v14 = vpop.f32.mrb[13].mxu1  ;;  %v1857_v42 = vadd.f32 %v871_v16, %v1769_v28 }
 0x159   : > { %v1845_v20 = vadd.f32 %v820_v17, %v1769_v28  ;;  %v822_v21 = vpop.f32.mrb[14].mxu0  ;;  %v875_v24 = vpop.f32.mrb[14].mxu1  ;;  %v1862_v46 = vadd.f32 %v873_v14, %v1769_v28 }
 0x15a   : > { %v901_v23 = vadd.f32 %v900_v11, %v1841_v15  ;;  %v1850_v0 = vadd.f32 %v822_v21, %v1783_v35  ;;  %v824_v25 = vpop.f32.mrb[15].mxu0  ;;  %887 = vadd.xlane.f32.xlu0 %v886_v18  ;;  %v895_v31 = vadd.f32 %v894_v19, %v1838_v13  ;;  %v877_v38 = vpop.f32.mrb[15].mxu1  ;;  %v1865_v49 = vadd.f32 %v875_v24, %v1783_v35 }
 0x15b   : > { %v1854_v33 = vadd.f32 %v824_v25, %v1783_v35  ;;  %v1872_v56 = vadd.f32 %v877_v38, %v1783_v35 }
 0x15c   : > { %v902_v43 = vadd.f32 %v901_v23, %v1845_v20  ;;  %v910_v45 = vadd.f32 %v909_v22, %v1850_v0  ;;  %896 = vadd.xlane.f32.xlu1 %v895_v31 }
 0x15e   : > { %v911_v50 = vadd.f32 %v910_v45, %v1854_v33  ;;  %v903_v51 = vadd.f32 %v902_v43, %v1857_v42 }
 0x160   : > { %v904_v54 = vadd.f32 %v903_v51, %v1862_v46  ;;  %v912_v55 = vadd.f32 %v911_v50, %v1865_v49 }
 0x162   : > { %905 = vadd.xlane.f32.xlu0 %v904_v54  ;;  %v913_v57 = vadd.f32 %v912_v55, %v1872_v56 }
 0x166   : > { %914 = vadd.xlane.f32.xlu0 %v913_v57 }
 0x1e7   : > { %v888_v28 = vpop.xlane.xlu0 %887 }
 0x1e8   : > { %v916_v59 = vmul.f32 0.0009765625, %v888_v28 }
 0x1e9   : > { %v897_v60 = vpop.xlane.xlu1 %896 }
 0x1ea   : > { %v917_v61 = vmul.f32 0.0009765625, %v897_v60  ;;  %v1876_v1 = vsub.f32 %v1765_v26, %v916_v59  ;;  %v1879_v3 = vsub.f32 %v1767_v27, %v916_v59  ;;  %v1882_v4 = vsub.f32 %v1777_v32, %v916_v59 }
 0x1eb   : > { %v1885_v35 = vsub.f32 %v1792_v39, %v916_v59  ;;  %v1892_v10 = vsub.f32 %v1809_v48, %v916_v59  ;;  %v1895_v26 = vsub.f32 %v1816_v53, %v916_v59  ;;  %v1908_v48 = vsub.f32 %v862_v2, %v916_v59 }
 0x1ec   : > { %v952_v5 = vmul.f32 %v1876_v1, %v1876_v1  ;;  %v953_v9 = vmul.f32 %v1879_v3, %v1879_v3  ;;  %v954_v27 = vmul.f32 %v1882_v4, %v1882_v4  ;;  %v1900_v11 = vsub.f32 %v1771_v29, %v917_v61 }
 0x1ed   : > { %v1903_v39 = vsub.f32 %v1773_v30, %v917_v61  ;;  %v1906_v16 = vsub.f32 %v1781_v34, %v917_v61  ;;  %v955_v53 = vmul.f32 %v1885_v35, %v1885_v35  ;;  %v1912_v19 = vsub.f32 %v864_v7, %v916_v59 }
 0x1ee   : > { %v984_v32 = vadd.f32 %v953_v9, %v952_v5  ;;  %v1915_v14 = vsub.f32 %v1807_v47, %v917_v61  ;;  %v960_v29 = vmul.f32 %v1900_v11, %v1900_v11  ;;  %v956_v34 = vmul.f32 %v1892_v10, %v1892_v10 }
 0x1ef   : > { %v906_v12 = vpop.xlane.xlu0 %905  ;;  %v961_v30 = vmul.f32 %v1903_v39, %v1903_v39  ;;  %v957_v2 = vmul.f32 %v1895_v26, %v1895_v26  ;;  %v1926_v22 = vsub.f32 %v1820_v58, %v917_v61  ;;  %v962_v47 = vmul.f32 %v1906_v16, %v1906_v16 }
 0x1f0   : > { %v918_v17 = vmul.f32 0.0009765625, %v906_v12  ;;  %v985_v18 = vadd.f32 %v984_v32, %v954_v27  ;;  %v958_v31 = vmul.f32 %v1908_v48, %v1908_v48  ;;  %v1939_v43 = vsub.f32 %v1826_v63, %v917_v61 }
 0x1f1   : > { %v993_v23 = vadd.f32 %v961_v30, %v960_v29  ;;  %v959_v50 = vmul.f32 %v1912_v19, %v1912_v19  ;;  %v1949_v54 = vsub.f32 %v1834_v8, %v917_v61  ;;  %v964_v57 = vmul.f32 %v1926_v22, %v1926_v22 }
 0x1f2   : > { %v986_v21 = vadd.f32 %v985_v18, %v955_v53  ;;  %v1931_v24 = vsub.f32 %v1786_v36, %v918_v17  ;;  %v1934_v25 = vsub.f32 %v1789_v37, %v918_v17  ;;  %v1942_v58 = vsub.f32 %v1804_v44, %v918_v17 }
 0x1f3   : > { %v915_v7 = vpop.xlane.xlu0 %914  ;;  %v963_v36 = vmul.f32 %v1915_v14, %v1915_v14  ;;  %v994_v51 = vadd.f32 %v993_v23, %v962_v47  ;;  %v1956_v44 = vsub.f32 %v1838_v13, %v917_v61  ;;  %v1961_v59 = vsub.f32 %v1824_v62, %v918_v17 }
 0x1f4   : > { %v987_v38 = vadd.f32 %v986_v21, %v956_v34  ;;  %v919_v45 = vmul.f32 0.0009765625, %v915_v7  ;;  %v968_v55 = vmul.f32 %v1931_v24, %v1931_v24  ;;  %v969_v63 = vmul.f32 %v1934_v25, %v1934_v25 }
 0x1f5   : > { %v995_v28 = vadd.f32 %v994_v51, %v963_v36  ;;  %v965_v8 = vmul.f32 %v1939_v43, %v1939_v43  ;;  %v1966_v5 = vsub.f32 %v1841_v15, %v918_v17  ;;  %v970_v9 = vmul.f32 %v1942_v58, %v1942_v58 }
 0x1f6   : > { %v988_v37 = vadd.f32 %v987_v38, %v957_v2  ;;  %v1002_v13 = vadd.f32 %v969_v63, %v968_v55  ;;  %v1971_v61 = vsub.f32 %v1795_v40, %v919_v45  ;;  %v1974_v32 = vsub.f32 %v1798_v41, %v919_v45 }
 0x1f7   : > { %v996_v27 = vadd.f32 %v995_v28, %v964_v57  ;;  %v966_v12 = vmul.f32 %v1949_v54, %v1949_v54  ;;  %v1979_v53 = vsub.f32 %v1814_v52, %v919_v45  ;;  %v1982_v18 = vsub.f32 %v1845_v20, %v918_v17 }
 0x1f8   : > { %v989_v60 = vadd.f32 %v988_v37, %v958_v31  ;;  %v971_v29 = vmul.f32 %v1961_v59, %v1961_v59  ;;  %v1003_v30 = vadd.f32 %v1002_v13, %v970_v9  ;;  %v967_v40 = vmul.f32 %v1956_v44, %v1956_v44 }
 0x1f9   : > { %v997_v15 = vadd.f32 %v996_v27, %v965_v8  ;;  %v1989_v41 = vsub.f32 %v1832_v6, %v919_v45  ;;  %v976_v34 = vmul.f32 %v1971_v61, %v1971_v61  ;;  %v977_v52 = vmul.f32 %v1974_v32, %v1974_v32 }
 0x1fa   : > { %v990_v62 = vadd.f32 %v989_v60, %v959_v50  ;;  %v1996_v20 = vsub.f32 %v1857_v42, %v918_v17  ;;  %v972_v21 = vmul.f32 %v1966_v5, %v1966_v5  ;;  %v1004_v7 = vadd.f32 %v1003_v30, %v971_v29 }
 0x1fb   : > { %v998_v2 = vadd.f32 %v997_v15, %v966_v12  ;;  %v2001_v47 = vsub.f32 %v1850_v0, %v919_v45  ;;  %v978_v6 = vmul.f32 %v1979_v53, %v1979_v53  ;;  %v1011_v23 = vadd.f32 %v977_v52, %v976_v34 }
 0x1fc   : > { %991 = vadd.xlane.f32.xlu1 %v990_v62  ;;  %v2006_v38 = vsub.f32 %v1862_v46, %v918_v17  ;;  %v973_v50 = vmul.f32 %v1982_v18, %v1982_v18  ;;  %v1005_v42 = vadd.f32 %v1004_v7, %v972_v21  ;;  %v2011_v36 = vsub.f32 %v1854_v33, %v919_v45  ;;  %v1032_v7 = vld [vmem:[%s2178_s3] sm:$0xff] }
 0x1fd   : > { %v999_v31 = vadd.f32 %v998_v2, %v967_v40  ;;  %v979_v51 = vmul.f32 %v1989_v41, %v1989_v41  ;;  %v1012_v0 = vadd.f32 %v1011_v23, %v978_v6  ;;  %v974_v37 = vmul.f32 %v1996_v20, %v1996_v20 }
 0x1fe   : > { %v1006_v55 = vadd.f32 %v1005_v42, %v973_v50  ;;  %v2018_v63 = vsub.f32 %v1865_v49, %v919_v45  ;;  %v980_v46 = vmul.f32 %v2001_v47, %v2001_v47  ;;  %v975_v33 = vmul.f32 %v2006_v38, %v2006_v38 }
 0x1ff   : > { %1000 = vadd.xlane.f32.xlu0 %v999_v31  ;;  %v1013_v17 = vadd.f32 %v1012_v0, %v979_v51  ;;  %v2025_v28 = vsub.f32 %v1872_v56, %v919_v45  ;;  %v981_v60 = vmul.f32 %v2011_v36, %v2011_v36  ;;  %v1093_v56 = vld [vmem:[%s2179_s4 + $0x8] sm:$0xff]  ;;  %v1092_v45 = vld [vmem:[%s2179_s4] sm:$0xff] }
 0x200   : > { %v1007_v57 = vadd.f32 %v1006_v55, %v974_v37  ;;  %v982_v49 = vmul.f32 %v2018_v63, %v2018_v63  ;;  %v1033_v51 = vld [vmem:[%s2178_s3 + $0x8] sm:$0xff] }
 0x201   : > { %v1014_v8 = vadd.f32 %v1013_v17, %v980_v46  ;;  %v983_v13 = vmul.f32 %v2025_v28, %v2025_v28  ;;  %v1094_v46 = vld [vmem:[%s2179_s4 + $0x10] sm:$0xff] }
 0x202   : > { %v1008_v9 = vadd.f32 %v1007_v57, %v975_v33  ;;  %v1034_v17 = vld [vmem:[%s2178_s3 + $0x10] sm:$0xff] }
 0x203   : > { %v1015_v27 = vadd.f32 %v1014_v8, %v981_v60  ;;  %v1035_v60 = vld [vmem:[%s2178_s3 + $0x18] sm:$0xff] }
 0x204   : > { %1009 = vadd.xlane.f32.xlu1 %v1008_v9 }
 0x205   : > { %v1016_v62 = vadd.f32 %v1015_v27, %v982_v49  ;;  %v1095_v49 = vld [vmem:[%s2179_s4 + $0x18] sm:$0xff] }
 0x207   : > { %v1017_v12 = vadd.f32 %v1016_v62, %v983_v13 }
 0x209   : > { %1018 = vadd.xlane.f32.xlu0 %v1017_v12 }
 0x215   : > { %1103 = vperm.xlu1 %1401, %v1093_v56  }
 0x21f   : > { %1098 = vperm.xlu0 %1400, %v1092_v45  }
 0x289   : > { %v992_v15 = vpop.xlane.xlu1 %991 }
 0x28a   : > { %v1020_v29 = vmul.f32 0.0009765625, %v992_v15 }
 0x28c   : > { %v1024_v30 = vadd.f32 1e-05, %v1020_v29  ;;  %v1001_v40 = vpop.xlane.xlu0 %1000 }
 0x28d   : > { %v1021_v34 = vmul.f32 0.0009765625, %v1001_v40 }
 0x28e   : > { %1404 = vrsqrt.f32 %v1024_v30 }
 0x28f   : > { %v1025_v52 = vadd.f32 1e-05, %v1021_v34 }
 0x291   : > { %1406 = vrsqrt.f32 %v1025_v52  ;;  %v1010_v2 = vpop.xlane.xlu1 %1009 }
 0x292   : > { %v1022_v21 = vmul.f32 0.0009765625, %v1010_v2 }
 0x294   : > { %v1026_v6 = vadd.f32 1e-05, %v1022_v21 }
 0x295   : > { %v1104_v27 = vpop.permute.xlu1 %1103 }
 0x296   : > { %1408 = vrsqrt.f32 %v1026_v6  ;;  %v1019_v31 = vpop.xlane.xlu0 %1018 }
 0x297   : > { %v1023_v42 = vmul.f32 0.0009765625, %v1019_v31 }
 0x298   : > { %v1405_v23 = vpop.eup %1404 }
 0x299   : > { %v1036_v50 = vmul.f32 %v1405_v23, %v1032_v7  ;;  %v1027_v0 = vadd.f32 1e-05, %v1023_v42 }
 0x29b   : > { %1042 = vperm.xlu1 %1401, %v1036_v50   ;;  %v1407_v37 = vpop.eup %1406  ;;  %1410 = vrsqrt.f32 %v1027_v0 }
 0x29c   : > { %v1037_v55 = vmul.f32 %v1407_v37, %v1033_v51 }
 0x29e   : > { %1047 = vperm.xlu0 %1400, %v1037_v55   ;;  %v1099_v62 = vpop.permute.xlu0 %1098 }
 0x2a0   : > { %v1409_v33 = vpop.eup %1408 }
 0x2a1   : > { %v1038_v57 = vmul.f32 %v1409_v33, %v1034_v17 }
 0x2a2   : > { %1108 = vperm.xlu0 %1400, %v1094_v46  }
 0x2a3   : > { %1052 = vperm.xlu1 %1401, %v1038_v57  }
 0x2a5   : > { %v1411_v8 = vpop.eup %1410 }
 0x2a6   : > { %v1039_v9 = vmul.f32 %v1411_v8, %v1035_v60 }
 0x2a8   : > { %1057 = vperm.xlu1 %1401, %v1039_v9  }
 0x2ac   : > { %1113 = vperm.xlu1 %1401, %v1095_v49  }
 0x31a   : > { %v1043_v13 = vpop.permute.xlu1 %1042 }
 0x31b   : > { %v1060_v12 = vmul.f32 %v1043_v13, %v1876_v1  ;;  %v1061_v56 = vmul.f32 %v1043_v13, %v1879_v3  ;;  %v1062_v45 = vmul.f32 %v1043_v13, %v1882_v4  ;;  %v1063_v15 = vmul.f32 %v1043_v13, %v1885_v35 }
 0x31c   : > { %v1064_v29 = vmul.f32 %v1043_v13, %v1892_v10  ;;  %v1065_v30 = vmul.f32 %v1043_v13, %v1895_v26  ;;  %v1066_v40 = vmul.f32 %v1043_v13, %v1908_v48  ;;  %v1067_v34 = vmul.f32 %v1043_v13, %v1912_v19 }
 0x31d   : > { %v1116_v52 = vadd.f32 %v1099_v62, %v1060_v12  ;;  %v1117_v2 = vadd.f32 %v1099_v62, %v1061_v56  ;;  %v1118_v21 = vadd.f32 %v1099_v62, %v1062_v45  ;;  %v1119_v7 = vadd.f32 %v1099_v62, %v1063_v15  ;;  %v1048_v4 = vpop.permute.xlu0 %1047 }
 0x31e   : > { %v1120_v6 = vadd.f32 %v1099_v62, %v1064_v29  ;;  %v1121_v1 = vadd.f32 %v1099_v62, %v1065_v30  ;;  %v1122_v23 = vadd.f32 %v1099_v62, %v1066_v40  ;;  %v1123_v3 = vadd.f32 %v1099_v62, %v1067_v34 }
 0x31f   : > { %1148 = vst [vmem:[%s2066_s28] sm:$0xff] %v1116_v52  ;;  %1149 = vst [vmem:[%s2066_s28 + $0x8] sm:$0xff] %v1117_v2  ;;  %v1068_v35 = vmul.f32 %v1048_v4, %v1900_v11  ;;  %v1069_v10 = vmul.f32 %v1048_v4, %v1903_v39  ;;  %v1070_v26 = vmul.f32 %v1048_v4, %v1906_v16 }
 0x320   : > { %1150 = vst [vmem:[%s2066_s28 + $0x10] sm:$0xff] %v1118_v21  ;;  %1151 = vst [vmem:[%s2066_s28 + $0x18] sm:$0xff] %v1119_v7  ;;  %v1071_v48 = vmul.f32 %v1048_v4, %v1915_v14  ;;  %v1072_v19 = vmul.f32 %v1048_v4, %v1926_v22  ;;  %v1073_v31 = vmul.f32 %v1048_v4, %v1939_v43 }
 0x321   : > { %1152 = vst [vmem:[%s2066_s28 + $0x20] sm:$0xff] %v1120_v6  ;;  %1153 = vst [vmem:[%s2066_s28 + $0x28] sm:$0xff] %v1121_v1  ;;  %v1074_v50 = vmul.f32 %v1048_v4, %v1949_v54  ;;  %v1075_v11 = vmul.f32 %v1048_v4, %v1956_v44  ;;  %v1124_v39 = vadd.f32 %v1104_v27, %v1068_v35  ;;  %v1109_v17 = vpop.permute.xlu0 %1108 }
 0x322   : > { %1154 = vst [vmem:[%s2066_s28 + $0x30] sm:$0xff] %v1122_v23  ;;  %1155 = vst [vmem:[%s2066_s28 + $0x38] sm:$0xff] %v1123_v3  ;;  %v1125_v42 = vadd.f32 %v1104_v27, %v1069_v10  ;;  %v1126_v51 = vadd.f32 %v1104_v27, %v1070_v26  ;;  %v1127_v16 = vadd.f32 %v1104_v27, %v1071_v48  ;;  %v1053_v22 = vpop.permute.xlu1 %1052 }
 0x323   : > { %v1128_v0 = vadd.f32 %v1104_v27, %v1072_v19  ;;  %v1129_v37 = vadd.f32 %v1104_v27, %v1073_v31  ;;  %v1130_v14 = vadd.f32 %v1104_v27, %v1074_v50  ;;  %v1131_v55 = vadd.f32 %v1104_v27, %v1075_v11  ;;  %1156 = vst [vmem:[%s2066_s28 + $0x40] sm:$0xff] %v1124_v39 }
 0x324   : > { %1157 = vst [vmem:[%s2066_s28 + $0x48] sm:$0xff] %v1125_v42  ;;  %1158 = vst [vmem:[%s2066_s28 + $0x50] sm:$0xff] %v1126_v51  ;;  %v1076_v43 = vmul.f32 %v1053_v22, %v1931_v24  ;;  %v1077_v54 = vmul.f32 %v1053_v22, %v1934_v25  ;;  %v1078_v44 = vmul.f32 %v1053_v22, %v1942_v58 }
 0x325   : > { %1159 = vst [vmem:[%s2066_s28 + $0x58] sm:$0xff] %v1127_v16  ;;  %1160 = vst [vmem:[%s2066_s28 + $0x60] sm:$0xff] %v1128_v0  ;;  %v1079_v46 = vmul.f32 %v1053_v22, %v1961_v59  ;;  %v1080_v33 = vmul.f32 %v1053_v22, %v1966_v5  ;;  %v1081_v57 = vmul.f32 %v1053_v22, %v1982_v18 }
 0x326   : > { %1161 = vst [vmem:[%s2066_s28 + $0x68] sm:$0xff] %v1129_v37  ;;  %1162 = vst [vmem:[%s2066_s28 + $0x70] sm:$0xff] %v1130_v14  ;;  %v1082_v60 = vmul.f32 %v1053_v22, %v1996_v20  ;;  %v1083_v24 = vmul.f32 %v1053_v22, %v2006_v38  ;;  %v1132_v25 = vadd.f32 %v1109_v17, %v1076_v43 }
 0x327   : > { %1163 = vst [vmem:[%s2066_s28 + $0x78] sm:$0xff] %v1131_v55  ;;  %v1133_v58 = vadd.f32 %v1109_v17, %v1077_v54  ;;  %v1134_v8 = vadd.f32 %v1109_v17, %v1078_v44  ;;  %v1135_v59 = vadd.f32 %v1109_v17, %v1079_v46  ;;  %v1136_v9 = vadd.f32 %v1109_v17, %v1080_v33  ;;  %v1058_v18 = vpop.permute.xlu1 %1057 }
 0x328   : > { %v1137_v49 = vadd.f32 %v1109_v17, %v1081_v57  ;;  %v1138_v27 = vadd.f32 %v1109_v17, %v1082_v60  ;;  %v1139_v5 = vadd.f32 %v1109_v17, %v1083_v24  ;;  %1164 = vst [vmem:[%s2066_s28 + $0x80] sm:$0xff] %v1132_v25  ;;  %v1084_v20 = vmul.f32 %v1058_v18, %v1971_v61 }
 0x329   : > { %1165 = vst [vmem:[%s2066_s28 + $0x88] sm:$0xff] %v1133_v58  ;;  %1166 = vst [vmem:[%s2066_s28 + $0x90] sm:$0xff] %v1134_v8  ;;  %v1085_v38 = vmul.f32 %v1058_v18, %v1974_v32  ;;  %v1086_v13 = vmul.f32 %v1058_v18, %v1979_v53  ;;  %v1087_v62 = vmul.f32 %v1058_v18, %v1989_v41 }
 0x32a   : > { %1167 = vst [vmem:[%s2066_s28 + $0x98] sm:$0xff] %v1135_v59  ;;  %1168 = vst [vmem:[%s2066_s28 + $0xa0] sm:$0xff] %v1136_v9  ;;  %v1088_v12 = vmul.f32 %v1058_v18, %v2001_v47  ;;  %v1089_v56 = vmul.f32 %v1058_v18, %v2011_v36  ;;  %v1090_v45 = vmul.f32 %v1058_v18, %v2018_v63 }
 0x32b   : > { %1169 = vst [vmem:[%s2066_s28 + $0xa8] sm:$0xff] %v1137_v49  ;;  %1170 = vst [vmem:[%s2066_s28 + $0xb0] sm:$0xff] %v1138_v27  ;;  %v1091_v15 = vmul.f32 %v1058_v18, %v2025_v28  ;;  %v1114_v61 = vpop.permute.xlu1 %1113 }
 0x32c   : > { %1171 = vst [vmem:[%s2066_s28 + $0xb8] sm:$0xff] %v1139_v5  ;;  %v1140_v32 = vadd.f32 %v1114_v61, %v1084_v20  ;;  %v1141_v53 = vadd.f32 %v1114_v61, %v1085_v38  ;;  %v1142_v41 = vadd.f32 %v1114_v61, %v1086_v13  ;;  %v1143_v29 = vadd.f32 %v1114_v61, %v1087_v62 }
 0x32d   : > { %v1144_v47 = vadd.f32 %v1114_v61, %v1088_v12  ;;  %v1145_v36 = vadd.f32 %v1114_v61, %v1089_v56  ;;  %v1146_v63 = vadd.f32 %v1114_v61, %v1090_v45  ;;  %v1147_v28 = vadd.f32 %v1114_v61, %v1091_v15 }
 0x32e   : > { %1172 = vst [vmem:[%s2066_s28 + $0xc0] sm:$0xff] %v1140_v32  ;;  %1173 = vst [vmem:[%s2066_s28 + $0xc8] sm:$0xff] %v1141_v53 }
 0x32f   : > { %1174 = vst [vmem:[%s2066_s28 + $0xd0] sm:$0xff] %v1142_v41  ;;  %1175 = vst [vmem:[%s2066_s28 + $0xd8] sm:$0xff] %v1143_v29 }
 0x330   : > { %1176 = vst [vmem:[%s2066_s28 + $0xe0] sm:$0xff] %v1144_v47  ;;  %1177 = vst [vmem:[%s2066_s28 + $0xe8] sm:$0xff] %v1145_v36 }
 0x331   : > { %1178 = vst [vmem:[%s2066_s28 + $0xf0] sm:$0xff] %v1146_v63  ;;  %1179 = vst [vmem:[%s2066_s28 + $0xf8] sm:$0xff] %v1147_v28 }
 0x332   : > { %1455 = shalt.err (!%p1452_p2)
}
 0x333   : > { %s1456_s11 = scalar_lea.hbm %s2121_s15, 4096  ;;  %s1460_s25 = scalar_lea.hbm %s2180_s5, 8192 }
 0x334   : > { %p1457_p4 = scmp.ne.s32.totalorder %s2121_s15, %s1456_s11  ;;  %p1461_p9 = scmp.lt.u32.totalorder %s2121_s15, %s2180_s5 }
 0x335   : > { %p1462_p1 = scmp.lt.u32.totalorder %s1460_s25, %s1456_s11  ;;  %p1464_p6 = scmp.lt.u32.totalorder %s1456_s11, %s2121_s15 }
 0x336   : > { %p1458_p5 = pnand %p1457_p4, %p2187_p11 }
 0x337   : > { %p1463_p3 = por %p1462_p1, %p1461_p9 }
 0x338   : > { %p1459_p7 = pneg %p1458_p5 }
 0x339   : > { %p1465_p12 = por %p1464_p6, %p1463_p3 }
 0x33b   : > { %p1466_p13 = pnand %p1465_p12, %p1459_p7 }
 0x33d   : > { %1469 = shalt.err (!%p1466_p13)
}
 0x33e   : > { %s1515_s29 = smov 1024   ;;  %s1516_s22 = smov 64  }
 0x33f   : > { %1351 = dma.vmem_to_hbm [thread:$0]  (%p2187_p11), %s2123_s12, 4096, %s2121_s15, %s1181_s16, %s1515_s29, %s1515_s29, %s1516_s22  }
 0x340 PF: > { %s1209_s14 = sand.u32 1, %s1496_s18   ;;  %p2188_p8 = scmp.ne.s32.totalorder %s2185_s6, 0 }
 0x341   : > { %p2189_p10 = scmp.ge.s32.totalorder %s1508_s21, 2  ;;  %s1210_s8 = scalar_lea.sflag [#allocation4], %s1209_s14 }
 0x343   : > { %p1358_p0 = pnand %p2189_p10, %p2188_p8 }
 0x345   : > { %1491 = dma.done.wait (!%p1358_p0), %s1210_s8, 4096  }
 0x346   : > { %1493 = vsyncadd (!%p1358_p0), %s1210_s8, 4294963200  ;;  %p18_p2 = scmp.ge.s32.totalorder %s1572_s24, 4   ;;  %s2190_s18 = smov %s1500_s19 }
 0x347   : > { %s2191_s19 = smov %s1504_s20  ;;  %s2192_s20 = smov %s1584_s27 }
 0x348   : > { %s2193_s21 = smov %s1572_s24  ;;  %20 = sbr.rel (!%p18_p2) target bundleno = 5 (0x5), region = 85 }
 0x34f   :  { %1215 = vsyncpa [#allocation3], 1 }
 0x350   :  { %1217 = vsyncpa [#allocation3 + $0x1], 1 }
 0x351   :  { %1218 = vsyncpa [#allocation4], 1 }
 0x352   :  { %1220 = vsyncpa [#allocation4 + $0x1], 1 }

</bundles_post_ra>
